<compile_context>
chip_gen: v7x
topology: tpu7x:2x2x1
jax: 0.10.0
libtpu: 0.0.40
codegen_flags: <defaults>
</compile_context>

<pallas_src>
import jax
import jax.numpy as jnp
import numpy as np
from jax.experimental import pallas as pl
from jax.experimental.pallas import tpu as pltpu

LANE = 128
SUBLANE = 8
# Max rows per tile: 4096 rows * 128 lanes * 4 B = 2 MiB in + 6 MiB out per step,
# => 16 MiB double-buffered total.  Safe on every generation (incl. v7x's 64 MiB VMEM)
# and past the tile-size knee where per-step overhead is amortized.
MAX_TILE_ROWS = 4096


def head_kernel(w_ref, b_ref, x_ref, o_ref):
    """Fused 1x1-conv + BN(eval) + ReLU on one (batch, row-tile) block.

    w_ref, b_ref : SMEM (3,) f32 -- per-output-channel scale / shift with BatchNorm
                   (eval mode) folded into the conv parameters.
    x_ref        : VMEM (1, 1, TS, 128) -- dense tile of the single-channel input.
    o_ref        : VMEM (1, 3, TS, 128) -- matching tile of the 3-channel output.
    """
    x = x_ref[0, 0, :, :]                       # (TS, 128) -- load once, reuse for all 3 channels
    for c in range(3):                          # out_channels = 3, static unroll
        o_ref[0, c, :, :] = jnp.maximum(x * w_ref[c] + b_ref[c], 0.0)


def _choose_row_tile(rows, n_batch):
    """Pick the per-step row-tile size (second-to-last block dim)."""
    if rows <= MAX_TILE_ROWS:
        # Whole row extent fits in one tile.
        if n_batch >= 2 or rows < 2 * SUBLANE:
            return rows  # full-extent block is always a legal block shape
        # n_batch == 1: split rows so the grid has >= 2 steps (v7x megacore).
        ts = pl.cdiv(rows, 2)
        ts = ((ts + SUBLANE - 1) // SUBLANE) * SUBLANE  # multiple of 8 (< rows, so required)
        return min(ts, rows)
    return MAX_TILE_ROWS  # multiple of 8


def tseg_head(x_nchw, w_eff, b_eff):
    """Runs the fused conv1x1 + BN(eval) + ReLU head. x: (N, 1, H, W) f32 -> (N, 3, H, W)."""
    N, C, H, W = x_nchw.shape
    assert C == 1, "TSeg head expects a single input channel"
    L = H * W

    # Pad only to a multiple of 128 lanes (at most 127 elems per image).
    L128 = pl.cdiv(L, LANE) * LANE
    R = L128 // LANE

    x_flat = x_nchw.reshape(N, 1, L)
    if L128 != L:
        x_flat = jnp.pad(x_flat, ((0, 0), (0, 0), (0, L128 - L)))
    x4d = x_flat.reshape(N, 1, R, LANE)

    tile_rows = _choose_row_tile(R, N)
    num_t = pl.cdiv(R, tile_rows)               # ragged last tile handled by the pipeline

    cost = pl.CostEstimate(
        flops=2 * 3 * N * L,                    # mul + add per output element
        transcendentals=0,
        bytes_accessed=16 * N * L,              # 4 B read + 12 B written per input element
    )

    out = pl.pallas_call(
        head_kernel,
        out_shape=jax.ShapeDtypeStruct((N, 3, R, LANE), x4d.dtype),
        grid=(N, num_t),
        in_specs=[
            pl.BlockSpec(memory_space=pltpu.MemorySpace.SMEM),             # w_eff (3,)
            pl.BlockSpec(memory_space=pltpu.MemorySpace.SMEM),             # b_eff (3,)
            pl.BlockSpec((1, 1, tile_rows, LANE), lambda n, t: (n, 0, t, 0)),
        ],
        out_specs=pl.BlockSpec((1, 3, tile_rows, LANE), lambda n, t: (n, 0, t, 0)),
        compiler_params=pltpu.CompilerParams(
            dimension_semantics=("parallel", "parallel"),
            vmem_limit_bytes=48 << 20,          # generous headroom; footprint is ~16 MiB
        ),
        cost_estimate=cost,
    )(w_eff, b_eff, x4d)

    out = out.reshape(N, 3, L128)
    if L128 != L:
        out = out[:, :, :L]                     # only when L isn't 128-aligned; XLA fuses it
    # (N, 3, H*W) -> (N, 3, H, W): layout-preserving reshape, no transpose needed.
    return out.reshape(N, 3, H, W)


def make_params():
    """Deterministic synthetic params matching nn.Conv2d(1,3,1) + nn.BatchNorm2d(3) (eval)."""
    k = jax.random.PRNGKey(0)
    k_w, k_b = jax.random.split(k)
    conv_w = jax.random.normal(k_w, (3, 1, 1, 1), jnp.float32) * 0.5   # (Cout, Cin, 1, 1)
    conv_b = jax.random.normal(k_b, (3,), jnp.float32) * 0.1
    gamma = jnp.ones((3,), jnp.float32)
    beta = jnp.zeros((3,), jnp.float32)
    running_mean = jnp.zeros((3,), jnp.float32)
    running_var = jnp.ones((3,), jnp.float32)
    eps = 1e-5
    # Fold BN (eval mode) into the 1x1 conv: y = (conv(x) - mean)/sqrt(var+eps)*gamma + beta
    scale = gamma / jnp.sqrt(running_var + eps)
    w_eff = conv_w[:, 0, 0, 0] * scale                      # (3,)
    b_eff = (conv_b - running_mean) * scale + beta          # (3,)
    return w_eff, b_eff


if __name__ == "__main__":
    # Small shapes consistent with the module: batch=2, in_channels=1, 16x16 spatial.
    key = jax.random.PRNGKey(0)
    ir = jax.random.normal(key, (2, 1, 16, 16), jnp.float32)

    w_eff, b_eff = make_params()

    out = tseg_head(ir, w_eff, b_eff)
    out = jax.block_until_ready(out)

    # Pure-JAX reference for the implemented head (conv1x1 + BN(eval) + ReLU).
    ref = jnp.maximum(
        ir[:, 0:1, :, :] * w_eff.reshape(1, 3, 1, 1) + b_eff.reshape(1, 3, 1, 1), 0.0
    )
    np.testing.assert_allclose(np.asarray(out), np.asarray(ref), rtol=1e-6, atol=1e-6)
    assert out.shape == (2, 3, 16, 16)

    print("KERNEL_OK")
</pallas_src>

<mosaic_0001>
module attributes {stable_mosaic.version = 11 : i64} {
  func.func @head_kernel(%arg0: i32, %arg1: i32, %arg2: memref<3xf32, #tpu.memory_space<smem>>, %arg3: memref<3xf32, #tpu.memory_space<smem>>, %arg4: memref<1x1x2x128xf32, #tpu.memory_space<vmem>>, %arg5: memref<1x3x2x128xf32, #tpu.memory_space<vmem>>) attributes {dimension_semantics = [#tpu.dimension_semantics<parallel>, #tpu.dimension_semantics<parallel>], iteration_bounds = array<i64: 2, 1>, scalar_prefetch = 0 : i64, scratch_operands = 0 : i64, tpu.core_type = #tpu.core_type<tc>, window_params = [{transform_indices = @transform_0, window_bounds = array<i64: 3>}, {transform_indices = @transform_1, window_bounds = array<i64: 3>}, {transform_indices = @transform_2, window_bounds = array<i64: 1, 1, 2, 128>}, {transform_indices = @transform_3, window_bounds = array<i64: 1, 3, 2, 128>}]} {
    %c0 = arith.constant 0 : index
    %c0_0 = arith.constant 0 : index
    %c0_1 = arith.constant 0 : index
    %c0_2 = arith.constant 0 : index
    %0 = vector.load %arg4[%c0, %c0_0, %c0_1, %c0_2] : memref<1x1x2x128xf32, #tpu.memory_space<vmem>>, vector<1x1x2x128xf32>
    %1 = vector.shape_cast %0 : vector<1x1x2x128xf32> to vector<2x128xf32>
    %c0_3 = arith.constant 0 : index
    %2 = memref.load %arg2[%c0_3] : memref<3xf32, #tpu.memory_space<smem>>
    %3 = vector.broadcast %2 : f32 to vector<2x128xf32>
    %4 = arith.mulf %1, %3 : vector<2x128xf32>
    %c0_4 = arith.constant 0 : index
    %5 = memref.load %arg3[%c0_4] : memref<3xf32, #tpu.memory_space<smem>>
    %6 = vector.broadcast %5 : f32 to vector<2x128xf32>
    %7 = arith.addf %4, %6 : vector<2x128xf32>
    %cst = arith.constant 0.000000e+00 : f32
    %8 = vector.broadcast %cst : f32 to vector<2x128xf32>
    %9 = arith.maximumf %7, %8 : vector<2x128xf32>
    %c0_5 = arith.constant 0 : index
    %c0_6 = arith.constant 0 : index
    %c0_7 = arith.constant 0 : index
    %c0_8 = arith.constant 0 : index
    %10 = vector.load %arg5[%c0_5, %c0_6, %c0_7, %c0_8] : memref<1x3x2x128xf32, #tpu.memory_space<vmem>>, vector<1x1x2x128xf32>
    %11 = vector.shape_cast %10 : vector<1x1x2x128xf32> to vector<2x128xf32>
    %12 = vector.shape_cast %9 : vector<2x128xf32> to vector<1x1x2x128xf32>
    tpu.vector_store %arg5[%c0_5, %c0_6, %c0_7, %c0_8], %12 {strides = array<i32>} : memref<1x3x2x128xf32, #tpu.memory_space<vmem>>, vector<1x1x2x128xf32>,
    %c1 = arith.constant 1 : index
    %13 = memref.load %arg2[%c1] : memref<3xf32, #tpu.memory_space<smem>>
    %14 = vector.broadcast %13 : f32 to vector<2x128xf32>
    %15 = arith.mulf %1, %14 : vector<2x128xf32>
    %c1_9 = arith.constant 1 : index
    %16 = memref.load %arg3[%c1_9] : memref<3xf32, #tpu.memory_space<smem>>
    %17 = vector.broadcast %16 : f32 to vector<2x128xf32>
    %18 = arith.addf %15, %17 : vector<2x128xf32>
    %cst_10 = arith.constant 0.000000e+00 : f32
    %19 = vector.broadcast %cst_10 : f32 to vector<2x128xf32>
    %20 = arith.maximumf %18, %19 : vector<2x128xf32>
    %c0_11 = arith.constant 0 : index
    %c1_12 = arith.constant 1 : index
    %c0_13 = arith.constant 0 : index
    %c0_14 = arith.constant 0 : index
    %21 = vector.load %arg5[%c0_11, %c1_12, %c0_13, %c0_14] : memref<1x3x2x128xf32, #tpu.memory_space<vmem>>, vector<1x1x2x128xf32>
    %22 = vector.shape_cast %21 : vector<1x1x2x128xf32> to vector<2x128xf32>
    %23 = vector.shape_cast %20 : vector<2x128xf32> to vector<1x1x2x128xf32>
    tpu.vector_store %arg5[%c0_11, %c1_12, %c0_13, %c0_14], %23 {strides = array<i32>} : memref<1x3x2x128xf32, #tpu.memory_space<vmem>>, vector<1x1x2x128xf32>,
    %c2 = arith.constant 2 : index
    %24 = memref.load %arg2[%c2] : memref<3xf32, #tpu.memory_space<smem>>
    %25 = vector.broadcast %24 : f32 to vector<2x128xf32>
    %26 = arith.mulf %1, %25 : vector<2x128xf32>
    %c2_15 = arith.constant 2 : index
    %27 = memref.load %arg3[%c2_15] : memref<3xf32, #tpu.memory_space<smem>>
    %28 = vector.broadcast %27 : f32 to vector<2x128xf32>
    %29 = arith.addf %26, %28 : vector<2x128xf32>
    %cst_16 = arith.constant 0.000000e+00 : f32
    %30 = vector.broadcast %cst_16 : f32 to vector<2x128xf32>
    %31 = arith.maximumf %29, %30 : vector<2x128xf32>
    %c0_17 = arith.constant 0 : index
    %c2_18 = arith.constant 2 : index
    %c0_19 = arith.constant 0 : index
    %c0_20 = arith.constant 0 : index
    %32 = vector.load %arg5[%c0_17, %c2_18, %c0_19, %c0_20] : memref<1x3x2x128xf32, #tpu.memory_space<vmem>>, vector<1x1x2x128xf32>
    %33 = vector.shape_cast %32 : vector<1x1x2x128xf32> to vector<2x128xf32>
    %34 = vector.shape_cast %31 : vector<2x128xf32> to vector<1x1x2x128xf32>
    tpu.vector_store %arg5[%c0_17, %c2_18, %c0_19, %c0_20], %34 {strides = array<i32>} : memref<1x3x2x128xf32, #tpu.memory_space<vmem>>, vector<1x1x2x128xf32>,
    return
  }
  func.func @transform_0(%arg0: i32, %arg1: i32) -> i32 {
    %c0_i32 = arith.constant 0 : i32
    %c0_i32_0 = arith.constant 0 : i32
    return %c0_i32 : i32
  }
  func.func @transform_1(%arg0: i32, %arg1: i32) -> i32 {
    %c0_i32 = arith.constant 0 : i32
    %c0_i32_0 = arith.constant 0 : i32
    return %c0_i32 : i32
  }
  func.func @transform_2(%arg0: i32, %arg1: i32) -> (i32, i32, i32, i32) {
    %c0_i32 = arith.constant 0 : i32
    %c0_i32_0 = arith.constant 0 : i32
    %c0_i32_1 = arith.constant 0 : i32
    return %arg0, %c0_i32, %arg1, %c0_i32_0 : i32, i32, i32, i32
  }
  func.func @transform_3(%arg0: i32, %arg1: i32) -> (i32, i32, i32, i32) {
    %c0_i32 = arith.constant 0 : i32
    %c0_i32_0 = arith.constant 0 : i32
    %c0_i32_1 = arith.constant 0 : i32
    return %arg0, %c0_i32, %arg1, %c0_i32_0 : i32, i32, i32, i32
  }
}

</mosaic_0001>

<bundles_post_ra>
// kernel: tpu_custom_call.1
= control target key start
LH: loop header
LB: loop body
LE: loop exit
PB: predicated region body
PF: predicated region fallthrough
CT: control target
= control target key end

     0   :  { %8 = vsyncpa [#allocation4], 0  ;;  %s763_s0 = inlined_call_operand.hbm [shape: f32[3], index: 0, kind: input, shape index: {}]   ;;  %s764_s1 = inlined_call_operand.vmem [shape: f32[3], index: 1, kind: input, shape index: {}]   ;;  %s765_s2 = inlined_call_operand.vmem [shape: f32[2,1,2,128], index: 2, kind: input, shape index: {}]   ;;  %s766_s3 = inlined_call_operand.hbm [shape: f32[2,3,2,128], index: 3, kind: output, shape index: {}]  }
   0x1   :  { %9 = vsyncpa [#allocation5], 0 }
   0x2   :  { %10 = vsyncpa [#allocation3], 0 }
   0x3   :  { %12 = vsyncpa [#allocation3 + $0x1], 0  ;;  %s597_s12 = smov 0   ;;  %s599_s13 = smov 0  }
   0x4   :  { %s601_s14 = smov 0   ;;  %s603_s15 = smov 0  }
   0x5   :  { %s605_s16 = smov 0   ;;  %s607_s17 = smov 0  }
   0x6 LB: > { %s357_s18 = sadd.s32 4294967295, %s570_s17   ;;  %s358_s19 = sadd.s32 4294967294, %s570_s17   ;;  %s570_s17 = sphi %s607_s17, %s18_s17   ;;  %s566_s16 = sphi %s605_s16, %s779_s16   ;;  %s562_s15 = sphi %s603_s15, %s778_s15   ;;  %s558_s14 = sphi %s601_s14, %s777_s14   ;;  %s554_s13 = sphi %s599_s13, %s776_s13   ;;  %s550_s12 = sphi %s597_s12, %s775_s12  }
   0x7   : > { %s30_s20 = sadd.s32 1, %s566_s16  ;;  %s109_s21 = sadd.s32 1, %s558_s14 }
   0x8   : > { %p32_p0 = scmp.ge.s32.totalorder %s30_s20, 2  ;;  %p119_p1 = scmp.ne.s32.totalorder %s558_s14, %s554_s13 }
   0x9   : > { %p120_p2 = scmp.eq.s32.totalorder %s357_s18, 1  ;;  %p125_p3 = scmp.ne.s32.totalorder %s554_s13, %s550_s12 }
   0xa   : > { %s781_s20 = smov (%p32_p0, %s30_s20), 0  ;;  %p126_p5 = scmp.eq.s32.totalorder %s358_s19, 1 }
   0xb   : > { %p637_p4 = por %p120_p2, %p119_p1  ;;  %s104_s23 = ssub.s32 %s566_s16, %s781_s20 }
   0xc   : > { %p359_p6 = scmp.ge.s32.totalorder %s570_s17, 1  ;;  %p107_p7 = scmp.eq.s32.totalorder %s104_s23, 0 }
   0xd   : > { %s768_s22 = scalar_select %p637_p4, 1, 0 }
   0xe   : > { %p644_p8 = por %p126_p5, %p125_p3  ;;  %p133_p9 = scmp.lt.s32.totalorder %s570_s17, 3 }
   0xf   : > { %s650_s25 = scalar_select %p107_p7, %s558_s14, %s109_s21  }
  0x10   : > { %s769_s24 = scalar_select %p644_p8, 1, 0 }
  0x11   : > { %p652_p10 = pnand %p359_p6, %p133_p9  ;;  %p656_p11 = scmp.eq.s32.totalorder %s357_s18, 0 }
  0x12   : > { %s155_s30 = sshll.u32 %s764_s1, 4  ;;  %s456_s7 = scalar_lea.hbm %s763_s0, 16  ;;  %s156_s30 = int_to_ptr.vmem [resolvable:$true] %s155_s30 }
  0x13   : > { %p388_p12 = pneg %p652_p10  ;;  %p457_p0 = scmp.ne.s32.totalorder %s763_s0, %s456_s7 }
  0x14   : > { %p463_p5 = scmp.lt.u32.totalorder %s456_s7, %s763_s0 }
  0x15   : > { %p667_p13 = pnand %p656_p11, %p388_p12 }
  0x17   : > { %p458_p1 = pneg %p667_p13 }
  0x19   : > { %p459_p2 = pnand %p458_p1, %p457_p0 }
  0x1b   : > { %p460_p3 = pneg %p459_p2 }
  0x1d   : > { %p465_p6 = pnand %p463_p5, %p460_p3 }
  0x1f   : > { %468 = shalt.err (!%p465_p6)
}
  0x20   : > { %s572_s18 = smov [#allocation2]   ;;  %s469_s23 = scalar_lea.vmem %s156_s30, 16 }
  0x21   : > { %391 = dma.hbm_to_smem (!%p667_p13), %s763_s0, 16, %s572_s18, [#allocation4]  }
  0x22   : > { %p470_p7 = scmp.ne.s32.totalorder %s156_s30, %s469_s23  ;;  %p477_p8 = scmp.lt.s32.totalorder %s156_s30, %s156_s30 }
  0x23   : > { %p478_p0 = scmp.lt.s32.totalorder %s469_s23, %s469_s23 }
  0x24   : > { %p472_p9 = pnand %p470_p7, %p458_p1 }
  0x25   : > { %p479_p2 = por %p478_p0, %p477_p8 }
  0x26   : > { %p473_p12 = pneg %p472_p9 }
  0x28   : > { %p480_p4 = pnand %p479_p2, %p473_p12 }
  0x2a   : > { %483 = shalt.err (!%p480_p4)
}
  0x2b   : > { %s573_s28 = smov [#allocation6]   ;;  %178 = sbr.rel (%p652_p10) target bundleno = 88 (0x58), region = 32 }
  0x2c   : > { %394 = dma.vmem_to_smem (!%p667_p13), %s156_s30, 16, %s573_s28, [#allocation5]  }
  0x32   : > { %537 = dma.done.wait (%p656_p11), [#allocation4], 16  }
  0x33   : > { %539 = vsyncadd (%p656_p11), [#allocation4], 4294967280 }
  0x34   : > { %541 = dma.done.wait (%p656_p11), [#allocation5], 16  }
  0x35   : > { %543 = vsyncadd (%p656_p11), [#allocation5], 4294967280 }
  0x36   : > { %188 = sfence }
  0x37   : > { %p209_p4 = scmp.lt.s32.totalorder %s562_s15, 1  ;;  %s217_s26 = sld [smem:[#allocation2]] }
  0x38   : > { %s206_s30 = sand.u32 1, %s554_s13   ;;  %s220_s4 = sld [smem:[#allocation6]] }
  0x39   : > { %s210_s29 = scalar_select %p209_p4, %s562_s15, 1 }
  0x3a   : > { %s376_s9 = smul.u32 6, %s206_s30  ;;  %s367_s27 = sld [smem:[#allocation2 + $0x1]] }
  0x3b   : > { %s366_s5 = sshll.u32 %s210_s29, 1  ;;  %s368_s10 = sld [smem:[#allocation6 + $0x1]] }
  0x3c   : > { %s215_s8 = scalar_lea.vmem %s765_s2, %s366_s5  ;;  %s370_s11 = sld [smem:[#allocation2 + $0x2]] }
  0x3d   : > { %v216_v0 = vld [vmem:[%s215_s8] sm:$0x3]  ;;  %v218_v1 = vstv %s217_s26  ;;  %s371_s18 = sld [smem:[#allocation6 + $0x2]]  ;;  %s208_s19 = scalar_lea.vmem [#allocation7], %s376_s9 }
  0x3e   : > { %v219_v2 = vmul.f32 %v218_v1, %v216_v0  ;;  %v221_v3 = vstv %s220_s4  ;;  %s258_s21 = sshll.u32 %s208_s19, 4  ;;  %s377_s23 = smul.u32 96, %s562_s15  ;;  %s708_s21 = int_to_ptr.vmem [resolvable:$true] %s258_s21 }
  0x3f   : > { %s717_s4 = scalar_lea.sflag [#allocation3], %s206_s30  ;;  %s484_s15 = scalar_lea.vmem %s708_s21, 96 }
  0x40   : > { %v222_v4 = vadd.f32 %v221_v3, %v219_v2  ;;  %v226_v6 = vstv %s367_s27  ;;  %s713_s29 = scalar_lea.hbm %s766_s3, %s377_s23  ;;  %p485_p8 = scmp.ne.s32.totalorder %s708_s21, %s484_s15 }
  0x41   : > { %v227_v7 = vmul.f32 %v226_v6, %v216_v0  ;;  %v229_v8 = vstv %s368_s10  ;;  %p773_p10 = scmp.ne.s32.totalorder %s768_s22, 0  ;;  %s574_s5 = smov [#allocation7]  }
  0x42   : > { %v223_v5 = vmax.f32 %v222_v4, 0.0  ;;  %v235_v9 = vstv %s370_s11  ;;  %s488_s6 = sshll.u32 %s574_s5, 4  ;;  %s489_s6 = int_to_ptr.vmem [resolvable:$false] %s488_s6 }
  0x43   : > { %v236_v10 = vmul.f32 %v235_v9, %v216_v0  ;;  %v238_v11 = vstv %s371_s18  ;;  %v230_v12 = vadd.f32 %v229_v8, %v227_v7  ;;  %p486_p11 = pnand %p485_p8, %p773_p10  ;;  %s490_s7 = scalar_lea.vmem %s489_s6, 192 }
  0x44   : > { %224 = vst [vmem:[%s208_s19] sm:$0x3] %v223_v5  ;;  %p491_p1 = scmp.lt.s32.totalorder %s708_s21, %s489_s6  ;;  %p492_p3 = scmp.lt.s32.totalorder %s490_s7, %s484_s15 }
  0x45   : > { %v239_v13 = vadd.f32 %v238_v11, %v236_v10  ;;  %v231_v14 = vmax.f32 %v230_v12, 0.0  ;;  %p487_p13 = pneg %p486_p11 }
  0x46   : > { %p493_p5 = por %p492_p3, %p491_p1 }
  0x47   : > { %v240_v15 = vmax.f32 %v239_v13, 0.0  ;;  %369 = vst [vmem:[%s208_s19 + $0x2] sm:$0x3] %v231_v14 }
  0x48   : > { %p494_p6 = pnand %p493_p5, %p487_p13 }
  0x49   : > { %372 = vst [vmem:[%s208_s19 + $0x4] sm:$0x3] %v240_v15 }
  0x4a   : > { %497 = shalt.err (!%p494_p6)
}
  0x4b   : > { %s498_s30 = scalar_lea.hbm %s713_s29, 96  ;;  %s502_s27 = scalar_lea.hbm %s766_s3, 192 }
  0x4c   : > { %p499_p7 = scmp.ne.s32.totalorder %s713_s29, %s498_s30  ;;  %p503_p0 = scmp.lt.u32.totalorder %s713_s29, %s766_s3 }
  0x4d   : > { %p504_p2 = scmp.lt.u32.totalorder %s502_s27, %s498_s30  ;;  %p506_p8 = scmp.lt.u32.totalorder %s498_s30, %s713_s29 }
  0x4e   : > { %p500_p9 = pnand %p499_p7, %p773_p10 }
  0x4f   : > { %p505_p4 = por %p504_p2, %p503_p0 }
  0x50   : > { %p501_p12 = pneg %p500_p9 }
  0x51   : > { %p507_p11 = por %p506_p8, %p505_p4 }
  0x53   : > { %p508_p13 = pnand %p507_p11, %p501_p12 }
  0x55   : > { %511 = shalt.err (!%p508_p13)
}
  0x56   : > { %s575_s18 = smov 32   ;;  %s576_s19 = smov 2  }
  0x57   : > { %386 = dma.vmem_to_hbm [thread:$0]  (%p773_p10), %s708_s21, 96, %s713_s29, %s717_s4, %s575_s18, %s575_s18, %s576_s19  }
  0x58 PF: > { %p403_p1 = scmp.ge.s32.totalorder %s570_s17, 2  ;;  %s273_s23 = sand.u32 1, %s550_s12  }
  0x59   : > { %p774_p3 = scmp.ne.s32.totalorder %s769_s24, 0  ;;  %s274_s28 = scalar_lea.sflag [#allocation3], %s273_s23 }
  0x5b   : > { %p396_p5 = pnand %p403_p1, %p774_p3 }
  0x5d   : > { %545 = dma.done.wait (!%p396_p5), %s274_s28, 96  }
  0x5e   : > { %547 = vsyncadd (!%p396_p5), %s274_s28, 4294967200  ;;  %s18_s17 = sadd.s32 1, %s570_s17   ;;  %s775_s12 = smov %s554_s13 }
  0x5f   : > { %p15_p6 = scmp.ge.s32.totalorder %s18_s17, 4   ;;  %s776_s13 = smov %s558_s14 }
  0x60   : > { %s777_s14 = smov %s650_s25  ;;  %s778_s15 = smov %s566_s16 }
  0x61   : > { %s779_s16 = smov %s781_s20  ;;  %17 = sbr.rel (!%p15_p6) target bundleno = 6 (0x6), region = 79 }
  0x68   :  { %279 = vsyncpa [#allocation3], 1 }
  0x69   :  { %281 = vsyncpa [#allocation3 + $0x1], 1 }
  0x6a   :  { %282 = vsyncpa [#allocation4], 1 }
  0x6b   :  { %284 = vsyncpa [#allocation4 + $0x1], 1 }
  0x6c   :  { %285 = vsyncpa [#allocation5], 1 }
  0x6d   :  { %287 = vsyncpa [#allocation5 + $0x1], 1 }

</bundles_post_ra>
